<compile_context>
chip_gen: v7x
topology: tpu7x:2x2x1
jax: 0.10.0
libtpu: 0.0.40
codegen_flags: <defaults>
</compile_context>

<pallas_src>
import jax
import jax.numpy as jnp
from jax.experimental import pallas as pl
from jax.experimental.pallas import tpu as pltpu


def cat_slice_cat_kernel(x_ref, y_ref, z_ref, o_ref):
    # v = concat([x, y, z], axis=-1); v2 == v (full-extent slice);
    # out = concat([v, v2], axis=1).  Built in registers, stored once
    # (single full-block store instead of six masked partial stores).
    v = jnp.concatenate([x_ref[...], y_ref[...], z_ref[...]], axis=-1)
    o_ref[...] = jnp.concatenate([v, v], axis=1)


def cat_slice_cat(x, y, z):
    B, C, Lx = x.shape
    Ly = y.shape[-1]
    Lz = z.shape[-1]
    L = Lx + Ly + Lz
    out_shape = jax.ShapeDtypeStruct((B, 2 * C, L), x.dtype)

    itemsize = jnp.dtype(x.dtype).itemsize
    bytes_in = (x.size + y.size + z.size) * itemsize
    bytes_out = B * 2 * C * L * itemsize

    # No grid: single invocation, whole arrays resident in VMEM (total data is
    # ~1.5 KB, far below any VMEM limit on v5e/v6e/v7x).  This removes the
    # size-1-grid pipelining machinery entirely.
    return pl.pallas_call(
        cat_slice_cat_kernel,
        out_shape=out_shape,
        in_specs=[
            pl.BlockSpec(memory_space=pltpu.MemorySpace.VMEM),
            pl.BlockSpec(memory_space=pltpu.MemorySpace.VMEM),
            pl.BlockSpec(memory_space=pltpu.MemorySpace.VMEM),
        ],
        out_specs=pl.BlockSpec(memory_space=pltpu.MemorySpace.VMEM),
        cost_estimate=pl.CostEstimate(
            flops=0,
            transcendentals=0,
            bytes_accessed=bytes_in + bytes_out,
        ),
    )(x, y, z)


if __name__ == "__main__":
    key = jax.random.PRNGKey(0)
    kx, ky, kz = jax.random.split(key, 3)
    x = jax.random.normal(kx, (1, 3, 5), dtype=jnp.float32)
    y = jax.random.normal(ky, (1, 3, 11), dtype=jnp.float32)
    z = jax.random.normal(kz, (1, 3, 25), dtype=jnp.float32)

    out = jax.block_until_ready(cat_slice_cat(x, y, z))

    # Pure-JAX reference check (pure copy op -> exact equality).
    v_ref = jnp.concatenate([x, y, z], axis=-1)
    ref = jnp.concatenate([v_ref, v_ref], axis=1)
    assert out.shape == (1, 6, 41), out.shape
    assert jnp.array_equal(out, ref), "mismatch vs reference"

    print("KERNEL_OK")
</pallas_src>

<mosaic_0001>
module attributes {stable_mosaic.version = 11 : i64} {
  func.func @cat_slice_cat_kernel(%arg0: memref<1x3x5xf32, #tpu.memory_space<vmem>>, %arg1: memref<1x3x11xf32, #tpu.memory_space<vmem>>, %arg2: memref<1x3x25xf32, #tpu.memory_space<vmem>>, %arg3: memref<1x6x41xf32, #tpu.memory_space<vmem>>) attributes {dimension_semantics = [], scalar_prefetch = 0 : i64, scratch_operands = 0 : i64, tpu.core_type = #tpu.core_type<tc>} {
    %c0 = arith.constant 0 : index
    %c0_0 = arith.constant 0 : index
    %c0_1 = arith.constant 0 : index
    %0 = vector.load %arg0[%c0, %c0_0, %c0_1] : memref<1x3x5xf32, #tpu.memory_space<vmem>>, vector<1x3x5xf32>
    %c0_2 = arith.constant 0 : index
    %c0_3 = arith.constant 0 : index
    %c0_4 = arith.constant 0 : index
    %1 = vector.load %arg1[%c0_2, %c0_3, %c0_4] : memref<1x3x11xf32, #tpu.memory_space<vmem>>, vector<1x3x11xf32>
    %c0_5 = arith.constant 0 : index
    %c0_6 = arith.constant 0 : index
    %c0_7 = arith.constant 0 : index
    %2 = vector.load %arg2[%c0_5, %c0_6, %c0_7] : memref<1x3x25xf32, #tpu.memory_space<vmem>>, vector<1x3x25xf32>
    %3 = tpu.concatenate %0, %1, %2 in 2 : vector<1x3x5xf32>, vector<1x3x11xf32>, vector<1x3x25xf32> -> vector<1x3x41xf32>
    %4 = tpu.concatenate %3, %3 in 1 : vector<1x3x41xf32>, vector<1x3x41xf32> -> vector<1x6x41xf32>
    %c0_8 = arith.constant 0 : index
    %c0_9 = arith.constant 0 : index
    %c0_10 = arith.constant 0 : index
    %5 = vector.load %arg3[%c0_8, %c0_9, %c0_10] : memref<1x6x41xf32, #tpu.memory_space<vmem>>, vector<1x6x41xf32>
    tpu.vector_store %arg3[%c0_8, %c0_9, %c0_10], %4 {strides = array<i32>} : memref<1x6x41xf32, #tpu.memory_space<vmem>>, vector<1x6x41xf32>,
    return
  }
}

</mosaic_0001>

<bundles_post_ra>
// kernel: tpu_custom_call.1
= control target key start
LH: loop header
LB: loop body
LE: loop exit
PB: predicated region body
PF: predicated region fallthrough
CT: control target
= control target key end

     0   :  { %s42_s14 = smov 5   ;;  %s43_s17 = smov 16   ;;  %vm25_vm0 = vcmask 39936   ;;  %vm27_vm1 = vcmask 130048   ;;  %vm32_vm2 = vcmask 1042432   ;;  %vm34_vm3 = vcmask 332800   ;;  %s76_s1 = inlined_call_operand.vmem [shape: f32[1,3,11], index: 1, kind: input, shape index: {}]   ;;  %s77_s2 = inlined_call_operand.vmem [shape: f32[1,3,25], index: 2, kind: input, shape index: {}]   ;;  %s78_s0 = inlined_call_operand.vmem [shape: f32[1,3,5], index: 0, kind: input, shape index: {}]   ;;  %s79_s3 = inlined_call_operand.vmem [shape: f32[1,6,41], index: 3, kind: output, shape index: {}]  }
   0x1   :  { %v15_v0 = vld [vmem:[%s76_s1] sm:$0x7] }
   0x2   :  { %18 = vrot.lane.b32.xlu0 %v15_v0, %s42_s14  ;;  %v16_v1 = vld [vmem:[%s77_s2] sm:$0x7] }
   0x3   :  { %v14_v3 = vld [vmem:[%s78_s0] sm:$0x7] }
   0x6   :  { %22 = vrot.lane.b32.xlu0 %v16_v1, %s43_s17 }
  0x74   :  { %v19_v2 = vpop.permute.xlu0 %18 }
  0x75   :  { %v26_v4 = vsel %vm25_vm0, %v14_v3, %v19_v2 }
  0x78   :  { %v23_v5 = vpop.permute.xlu0 %22 }
  0x79   :  { %v28_v6 = vsel %vm27_vm1, %v26_v4, %v23_v5 }
  0x7a   :  { %v30_v7 = vrot.slane %v28_v6, 5 }
  0x7c   :  { %v33_v8 = vsel %vm32_vm2, %v28_v6, %v30_v7 }
  0x7d   :  { %35 = vst.msk [vmem:[%s79_s3] sm:$0x3f] %vm34_vm3, %v33_v8 }

</bundles_post_ra>
